<compile_context>
chip_gen: v5e
topology: v5e:2x2
jax: 0.10.0
libtpu: 0.0.40
codegen_flags: <defaults>
</compile_context>

<pallas_src>
import jax
import jax.numpy as jnp
from jax.experimental import pallas as pl
from jax.experimental.pallas import tpu as pltpu


def _round_up(x, m):
    return (x + m - 1) // m * m


def _num_tensorcores():
    """Best-effort detection of 2-TC-per-chip generations (v7x); fallback 1."""
    try:
        kind = jax.devices()[0].device_kind.lower()
        if any(tag in kind for tag in ("v7", "tpu7", "7x")):
            return 2
    except Exception:
        pass
    return 1


def _tile_plan(B, tile_m, min_tiles):
    """Pick (tm, n_tiles, padded_B): balanced tiles, lane/sublane aligned."""
    n_tiles = max(pl.cdiv(B, tile_m), min_tiles)
    if n_tiles > 1:
        # Lane-dense (1, tm) output blocks require tm % 128 == 0 when tiled.
        tm = _round_up(pl.cdiv(B, n_tiles), 128)
        n_tiles = pl.cdiv(B, tm)
    if n_tiles == 1:
        tm = _round_up(B, 16)      # bf16 packs 16 sublanes per vreg
    return tm, n_tiles, tm * n_tiles


def critic_kernel(z_ref,
                  w_in_ref, b_in_ref,
                  w0_ref, b0_ref,
                  w1_ref, b1_ref, w2_ref, b2_ref, w3_ref, b3_ref,
                  wo_ref, bo_ref,
                  out_ref):
    f32 = jnp.float32
    bf16 = jnp.bfloat16

    # Fused input projections: z = [zM || zA], W_in = [[Wm 0]; [0 Wa]], so a
    # single matmul yields [zM@Wm || zA@Wa]; bias is [bm || ba].  The zero
    # blocks are free FLOPs on an otherwise underfilled MXU.
    proj = jnp.dot(z_ref[...], w_in_ref[...], preferred_element_type=f32) + b_in_ref[...]
    x = jnp.maximum(proj, 0.0).astype(bf16)          # leading ReLU of fw_layer

    # Layer 0: one K = 2*d_input matmul (the torch concat is already the lane
    # layout of `proj`, no cross-lane shuffle needed).
    x = jnp.dot(x, w0_ref[...], preferred_element_type=f32) + b0_ref[...]
    x = jnp.maximum(x, 0.0)

    # Remaining hidden layers: Linear -> ReLU (Dropout p=0 identity, no BN).
    for w_ref, b_ref in ((w1_ref, b1_ref), (w2_ref, b2_ref), (w3_ref, b3_ref)):
        x = jnp.dot(x.astype(bf16), w_ref[...], preferred_element_type=f32) + b_ref[...]
        x = jnp.maximum(x, 0.0)

    # Final Linear(d_mid, 1) emitted lane-dense: (1, d_mid) @ (tm, d_mid)^T
    # on the MXU gives a (1, tm) row, so the output store is unmasked/dense.
    logits = jax.lax.dot_general(
        wo_ref[...], x.astype(bf16),
        dimension_numbers=(((1,), (1,)), ((), ())),
        preferred_element_type=f32)                  # (1, tm)
    out_ref[...] = jax.nn.sigmoid(logits + bo_ref[0, 0])


def critic_forward(z_melody, z_accompany, params, *, tile_m=1024, min_tiles=None):
    """tile_m: max batch rows per grid step (primary knob for large batches)."""
    B = z_melody.shape[0]
    bf16 = jnp.bfloat16

    if min_tiles is None:
        # On 2-TC chips make sure both TensorCores get a grid step when there
        # is enough work to split.
        min_tiles = 2 if (_num_tensorcores() >= 2 and B >= 256) else 1

    tm, n_tiles, padded_B = _tile_plan(B, tile_m, min_tiles)

    z = jnp.concatenate([z_melody, z_accompany], axis=-1).astype(bf16)
    if padded_B != B:
        z = jnp.pad(z, ((0, padded_B - B), (0, 0)))

    d_zin = z.shape[1]
    d_cat = params["w_in"].shape[1]          # 2 * d_input
    d_mid = params["w1"].shape[1]

    weights = (params["w_in"], params["b_in"],
               params["w0"], params["b0"],
               params["w1"], params["b1"],
               params["w2"], params["b2"],
               params["w3"], params["b3"],
               params["wo"])
    bo = params["bo"]

    # Activations tiled over the batch (auto double-buffered by the pipeline).
    z_spec = pl.BlockSpec((tm, d_zin), lambda i: (i, 0))
    # Weights/biases: full-array blocks with constant index_map -> fetched once,
    # VMEM-resident across all batch tiles (~190 KB bf16 at these shapes).
    w_specs = [pl.BlockSpec(w.shape, lambda i: (0, 0)) for w in weights]
    # Scalar output bias lives in SMEM.
    bo_spec = pl.BlockSpec(memory_space=pltpu.MemorySpace.SMEM)
    # Lane-dense output: (1, tm) block of a (1, padded_B) row.
    out_spec = pl.BlockSpec((1, tm), lambda i: (0, i))

    flops = 2 * padded_B * (d_zin * d_cat + d_cat * d_mid + 3 * d_mid * d_mid + d_mid)
    bytes_accessed = (sum(int(w.size) * w.dtype.itemsize for w in weights)
                      + int(z.size) * 2 + padded_B * 4)

    out_row = pl.pallas_call(
        critic_kernel,
        out_shape=jax.ShapeDtypeStruct((1, padded_B), jnp.float32),
        grid=(n_tiles,),
        in_specs=[z_spec] + w_specs + [bo_spec],
        out_specs=out_spec,
        compiler_params=pltpu.CompilerParams(
            dimension_semantics=("parallel",)),
        cost_estimate=pl.CostEstimate(
            flops=flops,
            transcendentals=2 * padded_B,        # sigmoid ~ exp + reciprocal
            bytes_accessed=bytes_accessed),
    )(z, *weights, bo)

    return out_row[0, :B].reshape(B, 1)


def init_params(key, d_z_melody, d_z_accompany, d_input, d_mid):
    """Deterministic synthetic parameters; weights stored as (in, out)."""
    ks = jax.random.split(key, 14)

    def lin(kw, kb, fan_in, fan_out):
        scale = 1.0 / jnp.sqrt(jnp.float32(fan_in))
        w = jax.random.uniform(kw, (fan_in, fan_out), jnp.float32, -scale, scale)
        b = jax.random.uniform(kb, (1, fan_out), jnp.float32, -scale, scale)
        return w, b

    bf16 = jnp.bfloat16
    wm, bm = lin(ks[0], ks[1], d_z_melody, d_input)
    wa, ba = lin(ks[2], ks[3], d_z_accompany, d_input)
    w0, b0 = lin(ks[4], ks[5], 2 * d_input, d_mid)
    w1, b1 = lin(ks[6], ks[7], d_mid, d_mid)
    w2, b2 = lin(ks[8], ks[9], d_mid, d_mid)
    w3, b3 = lin(ks[10], ks[11], d_mid, d_mid)
    wo, bo = lin(ks[12], ks[13], d_mid, 1)

    # Block-diagonal fused input projection: [zM || zA] @ [[Wm 0]; [0 Wa]]
    # == [zM@Wm || zA@Wa], exactly the torch concat of the two projections.
    w_in = jnp.zeros((d_z_melody + d_z_accompany, 2 * d_input), jnp.float32)
    w_in = w_in.at[:d_z_melody, :d_input].set(wm)
    w_in = w_in.at[d_z_melody:, d_input:].set(wa)
    b_in = jnp.concatenate([bm, ba], axis=-1)

    p = {}
    # Matmul operands stored in bf16 (half the HBM weight traffic, MXU peak
    # rate); biases kept in f32.
    p["w_in"], p["b_in"] = w_in.astype(bf16), b_in
    p["w0"], p["b0"] = w0.astype(bf16), b0
    p["w1"], p["b1"] = w1.astype(bf16), b1
    p["w2"], p["b2"] = w2.astype(bf16), b2
    p["w3"], p["b3"] = w3.astype(bf16), b3
    p["wo"] = wo.T.astype(bf16)               # (1, d_mid) row for A @ B^T
    p["bo"] = bo                              # (1, 1) f32 scalar (SMEM)
    return p


def reference_forward(z_melody, z_accompany, p):
    """Pure-JAX reference using the same (bf16-rounded) weights in f32 math."""
    f32 = jnp.float32
    z = jnp.concatenate([z_melody, z_accompany], axis=-1)
    x = z @ p["w_in"].astype(f32) + p["b_in"]
    x = jnp.maximum(x, 0.0)
    x = jnp.maximum(x @ p["w0"].astype(f32) + p["b0"], 0.0)
    for i in (1, 2, 3):
        x = jnp.maximum(x @ p[f"w{i}"].astype(f32) + p[f"b{i}"], 0.0)
    logits = x @ p["wo"].astype(f32).T + p["bo"]
    return jax.nn.sigmoid(logits)


if __name__ == "__main__":
    # Small shapes consistent with the module's forward.
    B, d_z_melody, d_z_accompany = 8, 32, 48
    d_input, d_mid = 128, 128

    key = jax.random.PRNGKey(0)
    k_zm, k_za, k_p = jax.random.split(key, 3)

    z_melody = jax.random.normal(k_zm, (B, d_z_melody), jnp.float32)
    z_accompany = jax.random.normal(k_za, (B, d_z_accompany), jnp.float32)
    params = init_params(k_p, d_z_melody, d_z_accompany, d_input, d_mid)

    out = jax.block_until_ready(critic_forward(z_melody, z_accompany, params))
    ref = reference_forward(z_melody, z_accompany, params)
    assert out.shape == (B, 1)
    assert jnp.allclose(out, ref, atol=2e-2, rtol=2e-2)

    # Exercise the multi-tile grid + batch padding path (non-aligned batch).
    B2 = 300
    k2m, k2a = jax.random.split(jax.random.PRNGKey(1), 2)
    zm2 = jax.random.normal(k2m, (B2, d_z_melody), jnp.float32)
    za2 = jax.random.normal(k2a, (B2, d_z_accompany), jnp.float32)
    out2 = jax.block_until_ready(critic_forward(zm2, za2, params, tile_m=128))
    ref2 = reference_forward(zm2, za2, params)
    assert out2.shape == (B2, 1)
    assert jnp.allclose(out2, ref2, atol=2e-2, rtol=2e-2)

    # Exercise the forced >=2-tile (dual-TensorCore) path.
    out3 = jax.block_until_ready(
        critic_forward(zm2, za2, params, tile_m=1024, min_tiles=2))
    assert out3.shape == (B2, 1)
    assert jnp.allclose(out3, ref2, atol=2e-2, rtol=2e-2)

    print("KERNEL_OK")
</pallas_src>

<mosaic_0001>
module attributes {stable_mosaic.version = 11 : i64} {
  func.func @critic_kernel(%arg0: i32, %arg1: memref<16x80xbf16, #tpu.memory_space<vmem>>, %arg2: memref<80x256xbf16, #tpu.memory_space<vmem>>, %arg3: memref<1x256xf32, #tpu.memory_space<vmem>>, %arg4: memref<256x128xbf16, #tpu.memory_space<vmem>>, %arg5: memref<1x128xf32, #tpu.memory_space<vmem>>, %arg6: memref<128x128xbf16, #tpu.memory_space<vmem>>, %arg7: memref<1x128xf32, #tpu.memory_space<vmem>>, %arg8: memref<128x128xbf16, #tpu.memory_space<vmem>>, %arg9: memref<1x128xf32, #tpu.memory_space<vmem>>, %arg10: memref<128x128xbf16, #tpu.memory_space<vmem>>, %arg11: memref<1x128xf32, #tpu.memory_space<vmem>>, %arg12: memref<1x128xbf16, #tpu.memory_space<vmem>>, %arg13: memref<1x1xf32, #tpu.memory_space<smem>>, %arg14: memref<1x16xf32, #tpu.memory_space<vmem>>) attributes {dimension_semantics = [#tpu.dimension_semantics<parallel>], iteration_bounds = array<i64: 1>, scalar_prefetch = 0 : i64, scratch_operands = 0 : i64, tpu.core_type = #tpu.core_type<tc>, window_params = [{transform_indices = @transform_0, window_bounds = array<i64: 16, 80>}, {pipeline_mode = #tpu.pipeline_mode<synchronous>, transform_indices = @transform_1, window_bounds = array<i64: 80, 256>}, {pipeline_mode = #tpu.pipeline_mode<synchronous>, transform_indices = @transform_2, window_bounds = array<i64: 1, 256>}, {pipeline_mode = #tpu.pipeline_mode<synchronous>, transform_indices = @transform_3, window_bounds = array<i64: 256, 128>}, {pipeline_mode = #tpu.pipeline_mode<synchronous>, transform_indices = @transform_4, window_bounds = array<i64: 1, 128>}, {pipeline_mode = #tpu.pipeline_mode<synchronous>, transform_indices = @transform_5, window_bounds = array<i64: 128, 128>}, {pipeline_mode = #tpu.pipeline_mode<synchronous>, transform_indices = @transform_6, window_bounds = array<i64: 1, 128>}, {pipeline_mode = #tpu.pipeline_mode<synchronous>, transform_indices = @transform_7, window_bounds = array<i64: 128, 128>}, {pipeline_mode = #tpu.pipeline_mode<synchronous>, transform_indices = @transform_8, window_bounds = array<i64: 1, 128>}, {pipeline_mode = #tpu.pipeline_mode<synchronous>, transform_indices = @transform_9, window_bounds = array<i64: 128, 128>}, {pipeline_mode = #tpu.pipeline_mode<synchronous>, transform_indices = @transform_10, window_bounds = array<i64: 1, 128>}, {pipeline_mode = #tpu.pipeline_mode<synchronous>, transform_indices = @transform_11, window_bounds = array<i64: 1, 128>}, {transform_indices = @transform_12, window_bounds = array<i64: 1, 1>}, {transform_indices = @transform_13, window_bounds = array<i64: 1, 16>}]} {
    %c0 = arith.constant 0 : index
    %c0_0 = arith.constant 0 : index
    %0 = vector.load %arg1[%c0, %c0_0] : memref<16x80xbf16, #tpu.memory_space<vmem>>, vector<16x80xbf16>
    %c0_1 = arith.constant 0 : index
    %c0_2 = arith.constant 0 : index
    %1 = vector.load %arg2[%c0_1, %c0_2] : memref<80x256xbf16, #tpu.memory_space<vmem>>, vector<80x256xbf16>
    %cst = arith.constant dense<0.000000e+00> : vector<16x256xf32>
    %2 = tpu.matmul %0, %1, %cst {dimension_numbers = #tpu.dot_dimension_numbers<[1], [0], [0], [1], [0, 0, 1, 1], [], []>} : vector<16x80xbf16>, vector<80x256xbf16>, vector<16x256xf32> -> vector<16x256xf32>
    %c0_3 = arith.constant 0 : index
    %c0_4 = arith.constant 0 : index
    %3 = vector.load %arg3[%c0_3, %c0_4] : memref<1x256xf32, #tpu.memory_space<vmem>>, vector<1x256xf32>
    %4 = vector.broadcast %3 : vector<1x256xf32> to vector<16x256xf32>
    %5 = arith.addf %2, %4 : vector<16x256xf32>
    %cst_5 = arith.constant 0.000000e+00 : f32
    %6 = vector.broadcast %cst_5 : f32 to vector<16x256xf32>
    %7 = arith.maximumf %5, %6 : vector<16x256xf32>
    %8 = arith.truncf %7 : vector<16x256xf32> to vector<16x256xbf16>
    %c0_6 = arith.constant 0 : index
    %c0_7 = arith.constant 0 : index
    %9 = vector.load %arg4[%c0_6, %c0_7] : memref<256x128xbf16, #tpu.memory_space<vmem>>, vector<256x128xbf16>
    %cst_8 = arith.constant dense<0.000000e+00> : vector<16x128xf32>
    %10 = tpu.matmul %8, %9, %cst_8 {dimension_numbers = #tpu.dot_dimension_numbers<[1], [0], [0], [1], [0, 0, 1, 1], [], []>} : vector<16x256xbf16>, vector<256x128xbf16>, vector<16x128xf32> -> vector<16x128xf32>
    %c0_9 = arith.constant 0 : index
    %c0_10 = arith.constant 0 : index
    %11 = vector.load %arg5[%c0_9, %c0_10] : memref<1x128xf32, #tpu.memory_space<vmem>>, vector<1x128xf32>
    %12 = vector.broadcast %11 : vector<1x128xf32> to vector<16x128xf32>
    %13 = arith.addf %10, %12 : vector<16x128xf32>
    %cst_11 = arith.constant 0.000000e+00 : f32
    %14 = vector.broadcast %cst_11 : f32 to vector<16x128xf32>
    %15 = arith.maximumf %13, %14 : vector<16x128xf32>
    %16 = arith.truncf %15 : vector<16x128xf32> to vector<16x128xbf16>
    %c0_12 = arith.constant 0 : index
    %c0_13 = arith.constant 0 : index
    %17 = vector.load %arg6[%c0_12, %c0_13] : memref<128x128xbf16, #tpu.memory_space<vmem>>, vector<128x128xbf16>
    %cst_14 = arith.constant dense<0.000000e+00> : vector<16x128xf32>
    %18 = tpu.matmul %16, %17, %cst_14 {dimension_numbers = #tpu.dot_dimension_numbers<[1], [0], [0], [1], [0, 0, 1, 1], [], []>} : vector<16x128xbf16>, vector<128x128xbf16>, vector<16x128xf32> -> vector<16x128xf32>
    %c0_15 = arith.constant 0 : index
    %c0_16 = arith.constant 0 : index
    %19 = vector.load %arg7[%c0_15, %c0_16] : memref<1x128xf32, #tpu.memory_space<vmem>>, vector<1x128xf32>
    %20 = vector.broadcast %19 : vector<1x128xf32> to vector<16x128xf32>
    %21 = arith.addf %18, %20 : vector<16x128xf32>
    %cst_17 = arith.constant 0.000000e+00 : f32
    %22 = vector.broadcast %cst_17 : f32 to vector<16x128xf32>
    %23 = arith.maximumf %21, %22 : vector<16x128xf32>
    %24 = arith.truncf %23 : vector<16x128xf32> to vector<16x128xbf16>
    %c0_18 = arith.constant 0 : index
    %c0_19 = arith.constant 0 : index
    %25 = vector.load %arg8[%c0_18, %c0_19] : memref<128x128xbf16, #tpu.memory_space<vmem>>, vector<128x128xbf16>
    %cst_20 = arith.constant dense<0.000000e+00> : vector<16x128xf32>
    %26 = tpu.matmul %24, %25, %cst_20 {dimension_numbers = #tpu.dot_dimension_numbers<[1], [0], [0], [1], [0, 0, 1, 1], [], []>} : vector<16x128xbf16>, vector<128x128xbf16>, vector<16x128xf32> -> vector<16x128xf32>
    %c0_21 = arith.constant 0 : index
    %c0_22 = arith.constant 0 : index
    %27 = vector.load %arg9[%c0_21, %c0_22] : memref<1x128xf32, #tpu.memory_space<vmem>>, vector<1x128xf32>
    %28 = vector.broadcast %27 : vector<1x128xf32> to vector<16x128xf32>
    %29 = arith.addf %26, %28 : vector<16x128xf32>
    %cst_23 = arith.constant 0.000000e+00 : f32
    %30 = vector.broadcast %cst_23 : f32 to vector<16x128xf32>
    %31 = arith.maximumf %29, %30 : vector<16x128xf32>
    %32 = arith.truncf %31 : vector<16x128xf32> to vector<16x128xbf16>
    %c0_24 = arith.constant 0 : index
    %c0_25 = arith.constant 0 : index
    %33 = vector.load %arg10[%c0_24, %c0_25] : memref<128x128xbf16, #tpu.memory_space<vmem>>, vector<128x128xbf16>
    %cst_26 = arith.constant dense<0.000000e+00> : vector<16x128xf32>
    %34 = tpu.matmul %32, %33, %cst_26 {dimension_numbers = #tpu.dot_dimension_numbers<[1], [0], [0], [1], [0, 0, 1, 1], [], []>} : vector<16x128xbf16>, vector<128x128xbf16>, vector<16x128xf32> -> vector<16x128xf32>
    %c0_27 = arith.constant 0 : index
    %c0_28 = arith.constant 0 : index
    %35 = vector.load %arg11[%c0_27, %c0_28] : memref<1x128xf32, #tpu.memory_space<vmem>>, vector<1x128xf32>
    %36 = vector.broadcast %35 : vector<1x128xf32> to vector<16x128xf32>
    %37 = arith.addf %34, %36 : vector<16x128xf32>
    %cst_29 = arith.constant 0.000000e+00 : f32
    %38 = vector.broadcast %cst_29 : f32 to vector<16x128xf32>
    %39 = arith.maximumf %37, %38 : vector<16x128xf32>
    %c0_30 = arith.constant 0 : index
    %c0_31 = arith.constant 0 : index
    %40 = vector.load %arg12[%c0_30, %c0_31] : memref<1x128xbf16, #tpu.memory_space<vmem>>, vector<1x128xbf16>
    %41 = arith.truncf %39 : vector<16x128xf32> to vector<16x128xbf16>
    %cst_32 = arith.constant dense<0.000000e+00> : vector<1x16xf32>
    %42 = tpu.matmul %40, %41, %cst_32 {dimension_numbers = #tpu.dot_dimension_numbers<[1], [1], [0], [0], [0, 0, 1, 0], [], []>} : vector<1x128xbf16>, vector<16x128xbf16>, vector<1x16xf32> -> vector<1x16xf32>
    %c0_33 = arith.constant 0 : index
    %c0_34 = arith.constant 0 : index
    %43 = memref.load %arg13[%c0_33, %c0_34] : memref<1x1xf32, #tpu.memory_space<smem>>
    %44 = vector.broadcast %43 : f32 to vector<1x16xf32>
    %45 = arith.addf %42, %44 : vector<1x16xf32>
    %46 = arith.negf %45 : vector<1x16xf32>
    %47 = math.exp %46 : vector<1x16xf32>
    %cst_35 = arith.constant 1.000000e+00 : f32
    %48 = vector.broadcast %cst_35 : f32 to vector<1x16xf32>
    %49 = arith.addf %48, %47 : vector<1x16xf32>
    %50 = arith.divf %48, %49 : vector<1x16xf32>
    %c0_36 = arith.constant 0 : index
    %c0_37 = arith.constant 0 : index
    %51 = vector.load %arg14[%c0_36, %c0_37] : memref<1x16xf32, #tpu.memory_space<vmem>>, vector<1x16xf32>
    tpu.vector_store %arg14[%c0_36, %c0_37], %50 {strides = array<i32>} : memref<1x16xf32, #tpu.memory_space<vmem>>, vector<1x16xf32>,
    return
  }
  func.func @transform_0(%arg0: i32) -> (i32, i32) {
    %c0_i32 = arith.constant 0 : i32
    %c0_i32_0 = arith.constant 0 : i32
    return %arg0, %c0_i32 : i32, i32
  }
  func.func @transform_1(%arg0: i32) -> (i32, i32) {
    %c0_i32 = arith.constant 0 : i32
    %c0_i32_0 = arith.constant 0 : i32
    %c0_i32_1 = arith.constant 0 : i32
    return %c0_i32, %c0_i32_0 : i32, i32
  }
  func.func @transform_2(%arg0: i32) -> (i32, i32) {
    %c0_i32 = arith.constant 0 : i32
    %c0_i32_0 = arith.constant 0 : i32
    %c0_i32_1 = arith.constant 0 : i32
    return %c0_i32, %c0_i32_0 : i32, i32
  }
  func.func @transform_3(%arg0: i32) -> (i32, i32) {
    %c0_i32 = arith.constant 0 : i32
    %c0_i32_0 = arith.constant 0 : i32
    %c0_i32_1 = arith.constant 0 : i32
    return %c0_i32, %c0_i32_0 : i32, i32
  }
  func.func @transform_4(%arg0: i32) -> (i32, i32) {
    %c0_i32 = arith.constant 0 : i32
    %c0_i32_0 = arith.constant 0 : i32
    %c0_i32_1 = arith.constant 0 : i32
    return %c0_i32, %c0_i32_0 : i32, i32
  }
  func.func @transform_5(%arg0: i32) -> (i32, i32) {
    %c0_i32 = arith.constant 0 : i32
    %c0_i32_0 = arith.constant 0 : i32
    %c0_i32_1 = arith.constant 0 : i32
    return %c0_i32, %c0_i32_0 : i32, i32
  }
  func.func @transform_6(%arg0: i32) -> (i32, i32) {
    %c0_i32 = arith.constant 0 : i32
    %c0_i32_0 = arith.constant 0 : i32
    %c0_i32_1 = arith.constant 0 : i32
    return %c0_i32, %c0_i32_0 : i32, i32
  }
  func.func @transform_7(%arg0: i32) -> (i32, i32) {
    %c0_i32 = arith.constant 0 : i32
    %c0_i32_0 = arith.constant 0 : i32
    %c0_i32_1 = arith.constant 0 : i32
    return %c0_i32, %c0_i32_0 : i32, i32
  }
  func.func @transform_8(%arg0: i32) -> (i32, i32) {
    %c0_i32 = arith.constant 0 : i32
    %c0_i32_0 = arith.constant 0 : i32
    %c0_i32_1 = arith.constant 0 : i32
    return %c0_i32, %c0_i32_0 : i32, i32
  }
  func.func @transform_9(%arg0: i32) -> (i32, i32) {
    %c0_i32 = arith.constant 0 : i32
    %c0_i32_0 = arith.constant 0 : i32
    %c0_i32_1 = arith.constant 0 : i32
    return %c0_i32, %c0_i32_0 : i32, i32
  }
  func.func @transform_10(%arg0: i32) -> (i32, i32) {
    %c0_i32 = arith.constant 0 : i32
    %c0_i32_0 = arith.constant 0 : i32
    %c0_i32_1 = arith.constant 0 : i32
    return %c0_i32, %c0_i32_0 : i32, i32
  }
  func.func @transform_11(%arg0: i32) -> (i32, i32) {
    %c0_i32 = arith.constant 0 : i32
    %c0_i32_0 = arith.constant 0 : i32
    %c0_i32_1 = arith.constant 0 : i32
    return %c0_i32, %c0_i32_0 : i32, i32
  }
  func.func @transform_12(%arg0: i32) -> (i32, i32) {
    %c0_i32 = arith.constant 0 : i32
    %c0_i32_0 = arith.constant 0 : i32
    %c0_i32_1 = arith.constant 0 : i32
    return %c0_i32, %c0_i32_0 : i32, i32
  }
  func.func @transform_13(%arg0: i32) -> (i32, i32) {
    %c0_i32 = arith.constant 0 : i32
    %c0_i32_0 = arith.constant 0 : i32
    return %c0_i32, %arg0 : i32, i32
  }
}

</mosaic_0001>

<bundles_post_ra>
// kernel: tpu_custom_call.1
= control target key start
LH: loop header
LB: loop body
LE: loop exit
PB: predicated region body
PF: predicated region fallthrough
CT: control target
= control target key end

     0   :  { %19 = vsyncpa [#allocation4], 0  ;;  %s1305_s0 = inlined_call_operand.hbm [shape: bf16[16,80], index: 0, kind: input, shape index: {}]   ;;  %s1306_s1 = inlined_call_operand.hbm [shape: bf16[80,256], index: 1, kind: input, shape index: {}]   ;;  %s1307_s2 = inlined_call_operand.vmem [shape: f32[1,256], index: 2, kind: input, shape index: {}]   ;;  %s1308_s3 = inlined_call_operand.hbm [shape: bf16[256,128], index: 3, kind: input, shape index: {}]   ;;  %s1309_s4 = inlined_call_operand.vmem [shape: f32[1,128], index: 4, kind: input, shape index: {}]   ;;  %s1310_s5 = inlined_call_operand.hbm [shape: bf16[128,128], index: 5, kind: input, shape index: {}]   ;;  %s1311_s6 = inlined_call_operand.vmem [shape: f32[1,128], index: 6, kind: input, shape index: {}]   ;;  %s1312_s7 = inlined_call_operand.hbm [shape: bf16[128,128], index: 7, kind: input, shape index: {}]   ;;  %s1313_s8 = inlined_call_operand.vmem [shape: f32[1,128], index: 8, kind: input, shape index: {}]   ;;  %s1314_s9 = inlined_call_operand.hbm [shape: bf16[128,128], index: 9, kind: input, shape index: {}]   ;;  %s1315_s10 = inlined_call_operand.vmem [shape: f32[1,128], index: 10, kind: input, shape index: {}]   ;;  %s1316_s11 = inlined_call_operand.vmem [shape: bf16[1,128], index: 11, kind: input, shape index: {}]   ;;  %s1317_s12 = inlined_call_operand.<no memory space> [shape: f32[1,1], index: 12, kind: input, shape index: {}]   ;;  %s1318_s13 = inlined_call_operand.hbm [shape: f32[1,16], index: 13, kind: output, shape index: {}]  }
   0x1   :  { %20 = vsyncpa [#allocation7], 0 }
   0x2   :  { %21 = vsyncpa [#allocation10], 0 }
   0x3   :  { %22 = vsyncpa [#allocation13], 0  ;;  %s41_s27 = sshll.u32 %s1306_s1, 4  ;;  %s42_s27 = int_to_ptr.hbm [resolvable:$true] %s41_s27 }
   0x4   :  { %23 = vsyncpa [#allocation5], 0  ;;  %s1182_s28 = smov [#allocation6]   ;;  %s1183_s30 = smov 128  }
   0x5   :  { %s43_s29 = sshll.u32 %s1182_s28, 4  ;;  %s1184_s14 = smov 8   ;;  %s44_s29 = int_to_ptr.vmem [resolvable:$true] %s43_s29 }
   0x6   :  { %49 = dma.hbm_to_vmem [thread:$0]  %s42_s27, 1280, %s44_s29, [#allocation7], %s1183_s30, %s1183_s30, %s1184_s14  }
   0x7   :  { %s71_s17 = sshll.u32 %s1310_s5, 4  ;;  %s1185_s18 = smov [#allocation9]   ;;  %s72_s17 = int_to_ptr.hbm [resolvable:$true] %s71_s17 }
   0x8   :  { %s73_s19 = sshll.u32 %s1185_s18, 4  ;;  %s28_s22 = sshll.u32 %s1305_s0, 4  ;;  %s74_s19 = int_to_ptr.vmem [resolvable:$true] %s73_s19  ;;  %s29_s22 = int_to_ptr.hbm [resolvable:$true] %s28_s22 }
   0x9   :  { %s1186_s1 = smov 64   ;;  %s1187_s23 = smov 4  }
   0xa   :  { %79 = dma.hbm_to_vmem [thread:$0]  %s72_s17, 1024, %s74_s19, [#allocation10], %s1186_s1, %s1186_s1, %s1187_s23  }
   0xb   :  { %s56_s26 = sshll.u32 %s1308_s3, 4  ;;  %s1188_s27 = smov [#allocation3]   ;;  %s57_s26 = int_to_ptr.hbm [resolvable:$true] %s56_s26 }
   0xc   :  { %s30_s28 = sshll.u32 %s1188_s27, 4  ;;  %s1189_s5 = smov [#allocation8]   ;;  %s31_s28 = int_to_ptr.vmem [resolvable:$true] %s30_s28 }
   0xd   :  { %36 = dma.hbm_to_vmem [thread:$0]  %s29_s22, 128, %s31_s28, [#allocation4], %s1186_s1, %s1186_s1, %s1187_s23  }
   0xe   :  { %s58_s29 = sshll.u32 %s1189_s5, 4  ;;  %s86_s0 = sshll.u32 %s1312_s7, 4  ;;  %s59_s29 = int_to_ptr.vmem [resolvable:$true] %s58_s29  ;;  %s87_s0 = int_to_ptr.hbm [resolvable:$true] %s86_s0 }
   0xf   :  { %64 = dma.hbm_to_vmem [thread:$0]  %s57_s26, 2048, %s59_s29, [#allocation7], %s1186_s1, %s1186_s1, %s1187_s23  }
  0x10   :  { %s101_s17 = sshll.u32 %s1314_s9, 4  ;;  %s1190_s18 = smov [#allocation11]   ;;  %s102_s17 = int_to_ptr.hbm [resolvable:$true] %s101_s17 }
  0x11   :  { %s88_s3 = sshll.u32 %s1190_s18, 4  ;;  %s1191_s19 = smov [#allocation12]   ;;  %s89_s3 = int_to_ptr.vmem [resolvable:$true] %s88_s3 }
  0x12   :  { %94 = dma.hbm_to_vmem [thread:$0]  %s87_s0, 1024, %s89_s3, [#allocation10], %s1186_s1, %s1186_s1, %s1187_s23  }
  0x13   :  { %s103_s20 = sshll.u32 %s1191_s19, 4  ;;  %s104_s20 = int_to_ptr.vmem [resolvable:$true] %s103_s20 }
  0x14   :  { %109 = dma.hbm_to_vmem [thread:$0]  %s102_s17, 1024, %s104_s20, [#allocation13], %s1186_s1, %s1186_s1, %s1187_s23  }
  0x15   :  { %1172 = dma.done.wait [#allocation4], 128  }
  0x16   :  { %1173 = vsyncadd [#allocation4], 4294967168 }
  0x17   :  { %1174 = dma.done.wait [#allocation7], 3328  }
  0x18   :  { %1175 = vsyncadd [#allocation7], 4294963968 }
  0x19   :  { %1176 = dma.done.wait [#allocation10], 2048  }
  0x1a   :  { %1177 = vsyncadd [#allocation10], 4294965248 }
  0x1b   :  { %1178 = dma.done.wait [#allocation13], 1024  }
  0x1c   :  { %1179 = vsyncadd [#allocation13], 4294966272  ;;  %v765_v0 = vld [vmem:[#allocation6 + $0x40] sm:$0xf]  ;;  %v944_v1 = vld [vmem:[#allocation6 + $0x44] sm:$0xf0] }
  0x1d   :  { %v943_v2 = vld [vmem:[#allocation6 + $0x44] sm:$0xf]  ;;  %v766_v3 = vor.u32 %v944_v1, %v765_v0  ;;  %v767_v4 = vld [vmem:[#allocation6 + $0x48] sm:$0xf0]  ;;  %v757_v5 = vld [vmem:[#allocation6 + $0x30] sm:$0xf] }
  0x1e   :  { %v942_v6 = vld [vmem:[#allocation6 + $0x34] sm:$0xf0]  ;;  %v770_v7 = vor.u32 %v943_v2, %v767_v4  ;;  %v941_v8 = vld [vmem:[#allocation6 + $0x34] sm:$0xf]  ;;  %v759_v9 = vld [vmem:[#allocation6 + $0x38] sm:$0xf0] }
  0x1f   :  { %221 = vmatpush.bf16.msra.mxu0 %v766_v3  ;;  %v758_v10 = vor.u32 %v942_v6, %v757_v5  ;;  %v762_v11 = vor.u32 %v941_v8, %v759_v9  ;;  %v749_v12 = vld [vmem:[#allocation6 + $0x20] sm:$0xf]  ;;  %v940_v13 = vld [vmem:[#allocation6 + $0x24] sm:$0xf0]  ;;  %v939_v14 = vld [vmem:[#allocation6 + $0x24] sm:$0xf] }
  0x20   :  { %235 = vmatpush.bf16.msra.mxu1 %v770_v7  ;;  %v751_v15 = vld [vmem:[#allocation6 + $0x28] sm:$0xf0]  ;;  %v750_v16 = vor.u32 %v940_v13, %v749_v12  ;;  %v741_v20 = vld [vmem:[#allocation6 + $0x10] sm:$0xf]  ;;  %v938_v21 = vld [vmem:[#allocation6 + $0x14] sm:$0xf0] }
  0x21   :  { %v952_v17 = vld [vmem:[#allocation8 + $0x38] sm:$0xff]  ;;  %v754_v19 = vor.u32 %v939_v14, %v751_v15  ;;  %v937_v22 = vld [vmem:[#allocation6 + $0x14] sm:$0xf]  ;;  %v743_v23 = vld [vmem:[#allocation6 + $0x18] sm:$0xf0]  ;;  %v742_v26 = vor.u32 %v938_v21, %v741_v20  ;;  %vm214_vm0 = vcmask 654336  }
  0x22   :  { %v960_v18 = vld [vmem:[#allocation8 + $0x78] sm:$0xff]  ;;  %384 = vmatpush.bf16.msra.mxu2 %v952_v17  ;;  %v951_v24 = vld [vmem:[#allocation8 + $0x30] sm:$0xff]  ;;  %v746_v27 = vor.u32 %v937_v22, %v743_v23  ;;  %v950_v32 = vld [vmem:[#allocation8 + $0x28] sm:$0xff]  ;;  %vm705_vm4 = vcmask 122880  }
  0x23   :  { %222 = vmatpush.bf16.msra.mxu0 %v758_v10  ;;  %398 = vmatpush.bf16.msra.mxu3 %v960_v18  ;;  %v959_v25 = vld [vmem:[#allocation8 + $0x70] sm:$0xff]  ;;  %v936_v29 = vld [vmem:[#allocation6 + $0x4] sm:$0xf0]  ;;  %v735_v31 = vld [vmem:[#allocation6 + $0x8] sm:$0xf0] }
  0x24   :  { %236 = vmatpush.bf16.msra.mxu1 %v762_v11  ;;  %v733_v28 = vld [vmem:[#allocation6] sm:$0xf]  ;;  %v935_v30 = vld [vmem:[#allocation6 + $0x4] sm:$0xf]  ;;  %v958_v33 = vld [vmem:[#allocation8 + $0x68] sm:$0xff] }
  0x25   :  { %v734_v34 = vor.u32 %v936_v29, %v733_v28  ;;  %v738_v35 = vor.u32 %v935_v30, %v735_v31  ;;  %v949_v36 = vld [vmem:[#allocation8 + $0x20] sm:$0xff]  ;;  %v934_v38 = vld [vmem:[#allocation3] sm:$0xff]  ;;  %v948_v39 = vld [vmem:[#allocation8 + $0x18] sm:$0xff] }
  0x26   :  { %385 = vmatpush.bf16.msra.mxu2 %v951_v24  ;;  %v957_v37 = vld [vmem:[#allocation8 + $0x60] sm:$0xff]  ;;  %v956_v40 = vld [vmem:[#allocation8 + $0x58] sm:$0xff]  ;;  %v947_v41 = vld [vmem:[#allocation8 + $0x10] sm:$0xff] }
  0x27   :  { %223 = vmatpush.bf16.msra.mxu0 %v750_v16  ;;  %399 = vmatpush.bf16.msra.mxu3 %v959_v25  ;;  %v955_v42 = vld [vmem:[#allocation8 + $0x50] sm:$0xff]  ;;  %v946_v43 = vld [vmem:[#allocation8 + $0x8] sm:$0xff]  ;;  %v945_v45 = vld [vmem:[#allocation8] sm:$0xff] }
  0x28   :  { %237 = vmatpush.bf16.msra.mxu1 %v754_v19  ;;  %v954_v44 = vld [vmem:[#allocation8 + $0x48] sm:$0xff]  ;;  %v953_v46 = vld [vmem:[#allocation8 + $0x40] sm:$0xff]  ;;  %v968_v47 = vld [vmem:[#allocation9 + $0x38] sm:$0xff] }
  0x29   :  { %v967_v48 = vld [vmem:[#allocation9 + $0x30] sm:$0xff]  ;;  %v966_v49 = vld [vmem:[#allocation9 + $0x28] sm:$0xff]  ;;  %v965_v50 = vld [vmem:[#allocation9 + $0x20] sm:$0xff] }
  0x2a   :  { %386 = vmatpush.bf16.msra.mxu2 %v950_v32  ;;  %v153_v51 = vld [vmem:[%s1307_s2] sm:$0x3]  ;;  %v964_v4 = vld [vmem:[#allocation9 + $0x18] sm:$0xff]  ;;  %v963_v5 = vld [vmem:[#allocation9 + $0x10] sm:$0xff] }
  0x2b   :  { %224 = vmatpush.bf16.msra.mxu0 %v742_v26  ;;  %400 = vmatpush.bf16.msra.mxu3 %v958_v33  ;;  %v155_v54 = vperm.slane %v153_v51, 0  ;;  %v156_v55 = vperm.slane %v153_v51, 1  ;;  %v962_v6 = vld [vmem:[#allocation9 + $0x8] sm:$0xff]  ;;  %v961_v7 = vld [vmem:[#allocation9] sm:$0xff]  ;;  %v976_v8 = vld [vmem:[#allocation11 + $0x38] sm:$0xff] }
  0x2c   :  { %238 = vmatpush.bf16.msra.mxu1 %v746_v27  ;;  %v975_v9 = vld [vmem:[#allocation11 + $0x30] sm:$0xff]  ;;  %v974_v10 = vld [vmem:[#allocation11 + $0x28] sm:$0xff]  ;;  %v973_v11 = vld [vmem:[#allocation11 + $0x20] sm:$0xff] }
  0x2d   :  { %v996_v13 = vld [vmem:[%s1309_s4] ss:$0 sm:$0xff]  ;;  %v972_v24 = vld [vmem:[#allocation11 + $0x18] sm:$0xff]  ;;  %v971_v25 = vld [vmem:[#allocation11 + $0x10] sm:$0xff] }
  0x2e   :  { %387 = vmatpush.bf16.msra.mxu2 %v949_v36  ;;  %v970_v26 = vld [vmem:[#allocation11 + $0x8] sm:$0xff]  ;;  %v969_v27 = vld [vmem:[#allocation11] sm:$0xff]  ;;  %v984_v28 = vld [vmem:[#allocation12 + $0x38] sm:$0xff] }
  0x2f   :  { %225 = vmatpush.bf16.msra.mxu0 %v734_v34  ;;  %401 = vmatpush.bf16.msra.mxu3 %v957_v37  ;;  %v983_v29 = vld [vmem:[#allocation12 + $0x30] sm:$0xff]  ;;  %v982_v30 = vld [vmem:[#allocation12 + $0x28] sm:$0xff]  ;;  %v981_v31 = vld [vmem:[#allocation12 + $0x20] sm:$0xff] }
  0x30   :  { %239 = vmatpush.bf16.msra.mxu1 %v738_v35  ;;  %v997_v33 = vld [vmem:[%s1311_s6] ss:$0 sm:$0xff] }
  0x32   :  { %771 = vmatmul.msk.bf16.vlgmr.msra.gmra.mxu0 %vm214_vm0, %v934_v38  ;;  %388 = vmatpush.bf16.msra.mxu2 %v948_v39 }
  0x33   :  { %772 = vmatmul.msk.bf16.vlgmr.msra.gmra.mxu1 %vm214_vm0, %v934_v38  ;;  %402 = vmatpush.bf16.msra.mxu3 %v956_v40  ;;  %v980_v40 = vld [vmem:[#allocation12 + $0x18] sm:$0xff] }
  0x34   :  { %483 = vmatpush.bf16.msrb.mxu0 %v968_v47  ;;  %568 = vmatpush.bf16.msrb.mxu1 %v976_v8 }
  0x36   :  { %389 = vmatpush.bf16.msra.mxu2 %v947_v41  ;;  %v979_v41 = vld [vmem:[#allocation12 + $0x10] sm:$0xff] }
  0x37   :  { %403 = vmatpush.bf16.msra.mxu3 %v955_v42  ;;  %v978_v42 = vld [vmem:[#allocation12 + $0x8] sm:$0xff] }
  0x38   :  { %484 = vmatpush.bf16.msrb.mxu0 %v967_v48  ;;  %569 = vmatpush.bf16.msrb.mxu1 %v975_v9 }
  0x3a   :  { %390 = vmatpush.bf16.msra.mxu2 %v946_v43  ;;  %v977_v43 = vld [vmem:[#allocation12] sm:$0xff] }
  0x3b   :  { %404 = vmatpush.bf16.msra.mxu3 %v954_v44 }
  0x3c   :  { %485 = vmatpush.bf16.msrb.mxu0 %v966_v49  ;;  %570 = vmatpush.bf16.msrb.mxu1 %v974_v10 }
  0x3e   :  { %391 = vmatpush.bf16.msra.mxu2 %v945_v45  ;;  %v998_v45 = vld [vmem:[%s1313_s8] ss:$0 sm:$0xff] }
  0x3f   :  { %405 = vmatpush.bf16.msra.mxu3 %v953_v46 }
  0x40   :  { %486 = vmatpush.bf16.msrb.mxu0 %v965_v50  ;;  %571 = vmatpush.bf16.msrb.mxu1 %v973_v11 }
  0x42   :  { %653 = vmatpush.bf16.msrb.mxu2 %v984_v28 }
  0x44   :  { %487 = vmatpush.bf16.msrb.mxu0 %v964_v4  ;;  %572 = vmatpush.bf16.msrb.mxu1 %v972_v24 }
  0x46   :  { %654 = vmatpush.bf16.msrb.mxu2 %v983_v29 }
  0x48   :  { %488 = vmatpush.bf16.msrb.mxu0 %v963_v5  ;;  %573 = vmatpush.bf16.msrb.mxu1 %v971_v25 }
  0x4a   :  { %655 = vmatpush.bf16.msrb.mxu2 %v982_v30 }
  0x4c   :  { %489 = vmatpush.bf16.msrb.mxu0 %v962_v6  ;;  %574 = vmatpush.bf16.msrb.mxu1 %v970_v26 }
  0x4e   :  { %656 = vmatpush.bf16.msrb.mxu2 %v981_v31 }
  0x50   :  { %490 = vmatpush.bf16.msrb.mxu0 %v961_v7  ;;  %575 = vmatpush.bf16.msrb.mxu1 %v969_v27 }
  0x52   :  { %657 = vmatpush.bf16.msrb.mxu2 %v980_v40 }
  0x56   :  { %658 = vmatpush.bf16.msrb.mxu2 %v979_v41 }
  0x5a   :  { %659 = vmatpush.bf16.msrb.mxu2 %v978_v42 }
  0x5e   :  { %660 = vmatpush.bf16.msrb.mxu2 %v977_v43 }
  0xaf   :  { %v227_v52 = vpop.f32.mrf.mxu0 }
  0xb0   :  { %v241_v53 = vpop.f32.mrf.mxu1  ;;  %v228_v56 = vadd.f32 %v227_v52, %v155_v54 }
  0xb1   :  { %v242_v57 = vadd.f32 %v241_v53, %v156_v55  ;;  %v999_v53 = vld [vmem:[%s1315_s10] ss:$0 sm:$0xff]  ;;  %s1192_s10 = smov [#allocation14]  }
  0xb2   :  { %v246_v62 = vmax.f32 %v228_v56, 0.0 }
  0xb3   :  { %v247_v0 = vmax.f32 %v242_v57, 0.0 }
  0xb7   :  { %v229_v58 = vpop.f32.mrf.mxu0 }
  0xb8   :  { %v230_v59 = vadd.f32 %v229_v58, %v155_v54  ;;  %v243_v60 = vpop.f32.mrf.mxu1 }
  0xb9   :  { %v244_v61 = vadd.f32 %v243_v60, %v156_v55  ;;  %v669_v60 = vld [vmem:[%s1316_s11] sm:$0x1]  ;;  %s712_s11 = sshll.u32 %s1192_s10, 4  ;;  %s713_s11 = int_to_ptr.vmem [resolvable:$true] %s712_s11 }
  0xba   :  { %v248_v63 = vmax.f32 %v230_v59, 0.0 }
  0xbb   :  { %v249_v1 = vmax.f32 %v244_v61, 0.0  ;;  %v672_v61 = vstv %s1317_s12  ;;  %s714_s12 = sshll.u32 %s1318_s13, 4  ;;  %s715_s12 = int_to_ptr.hbm [resolvable:$true] %s714_s12 }
  0xbc   :  { %v250_v2 = vpack.c.bf16 %v248_v63, %v246_v62 }
  0xbd   :  { %v251_v3 = vpack.c.bf16 %v249_v1, %v247_v0 }
  0xbe   :  { %392 = vmatmul.bf16.vlgmr.msra.gmra.mxu2 %v250_v2 }
  0xbf   :  { %406 = vmatmul.bf16.vlgmr.msra.gmra.mxu3 %v251_v3 }
 0x141   :  { %v393_v12 = vpop.f32.mrf.mxu2 }
 0x142   :  { %v407_v14 = vpop.f32.mrf.mxu3  ;;  %v394_v15 = vadd.f32 %v996_v13, %v393_v12 }
 0x144   :  { %v408_v17 = vadd.f32 %v407_v14, %v394_v15 }
 0x146   :  { %v412_v21 = vmax.f32 %v408_v17, 0.0 }
 0x149   :  { %v395_v16 = vpop.f32.mrf.mxu2 }
 0x14a   :  { %v396_v18 = vadd.f32 %v996_v13, %v395_v16  ;;  %v409_v19 = vpop.f32.mrf.mxu3 }
 0x14c   :  { %v410_v20 = vadd.f32 %v409_v19, %v396_v18 }
 0x14e   :  { %v413_v22 = vmax.f32 %v410_v20, 0.0 }
 0x150   :  { %v414_v23 = vpack.c.bf16 %v413_v22, %v412_v21 }
 0x152   :  { %491 = vmatmul.bf16.vlgmr.msrb.gmra.mxu0 %v414_v23 }
 0x1cf   :  { %v492_v32 = vpop.f32.mrf.mxu0 }
 0x1d0   :  { %v493_v34 = vadd.f32 %v997_v33, %v492_v32 }
 0x1d2   :  { %v497_v37 = vmax.f32 %v493_v34, 0.0 }
 0x1d7   :  { %v494_v35 = vpop.f32.mrf.mxu0 }
 0x1d8   :  { %v495_v36 = vadd.f32 %v997_v33, %v494_v35 }
 0x1da   :  { %v498_v38 = vmax.f32 %v495_v36, 0.0 }
 0x1dc   :  { %v499_v39 = vpack.c.bf16 %v498_v38, %v497_v37 }
 0x1de   :  { %576 = vmatmul.bf16.vlgmr.msrb.gmra.mxu1 %v499_v39 }
 0x25b   :  { %v577_v44 = vpop.f32.mrf.mxu1 }
 0x25c   :  { %v578_v46 = vadd.f32 %v998_v45, %v577_v44 }
 0x25e   :  { %v582_v49 = vmax.f32 %v578_v46, 0.0 }
 0x263   :  { %v579_v47 = vpop.f32.mrf.mxu1 }
 0x264   :  { %v580_v48 = vadd.f32 %v998_v45, %v579_v47 }
 0x266   :  { %v583_v50 = vmax.f32 %v580_v48, 0.0 }
 0x268   :  { %v584_v51 = vpack.c.bf16 %v583_v50, %v582_v49 }
 0x26a   :  { %661 = vmatmul.bf16.vlgmr.msrb.gmra.mxu2 %v584_v51 }
 0x2ed   :  { %v662_v52 = vpop.f32.mrf.mxu2 }
 0x2ee   :  { %v663_v54 = vadd.f32 %v999_v53, %v662_v52 }
 0x2f0   :  { %v667_v57 = vmax.f32 %v663_v54, 0.0 }
 0x2f5   :  { %v664_v55 = vpop.f32.mrf.mxu2 }
 0x2f6   :  { %v665_v56 = vadd.f32 %v999_v53, %v664_v55 }
 0x2f8   :  { %v668_v58 = vmax.f32 %v665_v56, 0.0 }
 0x2fa   :  { %v670_v59 = vpack.c.bf16 %v668_v58, %v667_v57 }
 0x2fc   :  { %680 = vmatpush.bf16.xpose.msrb.mxu3 %v670_v59 }
 0x303   :  { %681 = vmatmul.bf16.vlgmr.msrb.gmra.mxu3 %v669_v60 }
 0x386   :  { %v682_v62 = vpop.f32.mrf.mxu3 }
 0x387   :  { %v683_v63 = vadd.f32 %v682_v62, %v672_v61 }
 0x389   :  { %v933_v0 = vmul.f32 -1.442695, %v683_v63 }
 0x38b   :  { %1000 = vpow2.f32 %v933_v0 }
 0x38e   :  { %v684_v1 = vpop.f32.mrf.mxu3 }
 0x391   :  { %v1001_v2 = vpop.eup %1000 }
 0x392   :  { %v689_v3 = vadd.f32 1.0, %v1001_v2 }
 0x394   :  { %1002 = vrcp.f32 %v689_v3  ;;  %v701_v7 = vand.u32 2147483648, %v689_v3  ;;  %v699_v9 = vand.u32 2147483647, %v689_v3  ;;  %vm695_vm2 = vweird.f32 %v689_v3 }
 0x396   :  { %v702_v11 = vor.u32 1.1754944e-38, %v701_v7  ;;  %vm700_vm5 = vcmp.eq.f32.partialorder %v699_v9, 8.507059e+37 }
 0x39a   :  { %v1003_v4 = vpop.eup %1002 }
 0x39b   :  { %v691_v5 = vmul.f32 %v1003_v4, %v689_v3  ;;  %vm696_vm1 = vweird.f32 %v1003_v4 }
 0x39c   :  { %vm697_vm3 = vmor %vm695_vm2, %vm696_vm1 }
 0x39d   :  { %v692_v6 = vsub.f32 1.0, %v691_v5 }
 0x39f   :  { %v693_v8 = vmul.f32 %v1003_v4, %v692_v6 }
 0x3a1   :  { %v694_v10 = vadd.f32 %v1003_v4, %v693_v8 }
 0x3a3   :  { %v698_v12 = vsel %vm697_vm3, %v1003_v4, %v694_v10 }
 0x3a4   :  { %v703_v13 = vsel %vm700_vm5, %v702_v11, %v698_v12 }
 0x3a5   :  { %706 = vst.msk [vmem:[#allocation14] sm:$0x1] %vm705_vm4, %v703_v13 }
 0x3a6   :  { %717 = dma.vmem_to_hbm [thread:$0]  %s713_s11, 16, %s715_s12, [#allocation5]  }
 0x3a7   :  { %1180 = dma.done.wait [#allocation5], 16  }
 0x3a8   :  { %1181 = vsyncadd [#allocation5], 4294967280 }
 0x3a9   :  { %722 = vsyncpa [#allocation4], 1 }
 0x3aa   :  { %723 = vsyncpa [#allocation7], 1 }
 0x3ab   :  { %724 = vsyncpa [#allocation10], 1 }
 0x3ac   :  { %725 = vsyncpa [#allocation13], 1 }
 0x3ad   :  { %726 = vsyncpa [#allocation5], 1 }

</bundles_post_ra>
